<compile_context>
chip_gen: v6e
topology: v6e:2x2x1
jax: 0.10.0
libtpu: 0.0.40
codegen_flags: <defaults>
</compile_context>

<pallas_src>
from functools import partial

import jax
import jax.numpy as jnp
from jax.experimental import pallas as pl
from jax.experimental.pallas import tpu as pltpu

HID_SIZE = 64
F_PAD = 128                      # padded hidden / action lane width
BIAS_ROWS = 8                    # bias block padded to one sublane group
MAX_TB = 1024                    # max batch-tile rows (f32; ~0.5 MiB per buffer)


def _round_up(n, m):
    return -(-n // m) * m


def _actor_kernel(x_ref, w_ref, o_ref, *, obs_pad):
    # x_ref: (TB, obs_pad)          zero-padded observations
    # w_ref: (obs_pad+2*128+8, 128) packed weight slab (resident across steps)
    # o_ref: (TB, 128)              lane-dense output (cols >= act_size are 0)
    x = x_ref[...]

    w1 = w_ref[0:obs_pad, :]
    w2 = w_ref[obs_pad:obs_pad + F_PAD, :]
    w3 = w_ref[obs_pad + F_PAD:obs_pad + 2 * F_PAD, :]
    biases = w_ref[obs_pad + 2 * F_PAD:obs_pad + 2 * F_PAD + BIAS_ROWS, :]
    b1 = biases[0:1, :]
    b2 = biases[1:2, :]
    b3 = biases[2:3, :]

    h1 = jnp.tanh(jnp.dot(x, w1, preferred_element_type=jnp.float32) + b1)
    h2 = jnp.tanh(jnp.dot(h1, w2, preferred_element_type=jnp.float32) + b2)
    out = jnp.tanh(jnp.dot(h2, w3, preferred_element_type=jnp.float32) + b3)
    o_ref[...] = out.astype(o_ref.dtype)


def pack_params(params):
    """Pack all weights/biases into one zero-padded (obs_pad+264, 128) f32 slab.

    Row layout:
      [0              : obs_pad       )  w1 padded to (obs_pad, 128)
      [obs_pad        : obs_pad + 128 )  w2 padded to (128, 128)
      [obs_pad + 128  : obs_pad + 256 )  w3 padded to (128, 128)
      [obs_pad + 256  : obs_pad + 264 )  biases: row0=b1, row1=b2, row2=b3
    """
    w1, b1 = params["w1"], params["b1"]
    w2, b2 = params["w2"], params["b2"]
    w3, b3 = params["w3"], params["b3"]
    obs_size = w1.shape[0]
    act_size = w3.shape[1]
    obs_pad = _round_up(max(obs_size, 8), F_PAD)

    rows = obs_pad + 2 * F_PAD + BIAS_ROWS
    slab = jnp.zeros((rows, F_PAD), jnp.float32)
    slab = slab.at[0:obs_size, :HID_SIZE].set(w1)
    slab = slab.at[obs_pad:obs_pad + HID_SIZE, :HID_SIZE].set(w2)
    slab = slab.at[obs_pad + F_PAD:obs_pad + F_PAD + HID_SIZE, :act_size].set(w3)
    slab = slab.at[obs_pad + 2 * F_PAD + 0, :HID_SIZE].set(b1.reshape(-1))
    slab = slab.at[obs_pad + 2 * F_PAD + 1, :HID_SIZE].set(b2.reshape(-1))
    slab = slab.at[obs_pad + 2 * F_PAD + 2, :act_size].set(b3.reshape(-1))
    return slab


@partial(jax.jit, static_argnames=("act_size",))
def model_actor_forward(x, slab, act_size):
    """ModelActor.forward as a fused Pallas TPU kernel.

    x:    (B, obs_size) float32
    slab: packed weights from pack_params()
    returns: (B, act_size) float32  (tanh-squashed mu)
    """
    B, obs_size = x.shape
    slab_rows = slab.shape[0]
    obs_pad = slab_rows - 2 * F_PAD - BIAS_ROWS

    # Batch tile: up to MAX_TB rows; small batches round up to a sublane multiple.
    tb = min(MAX_TB, max(8, _round_up(B, 8)))
    b_pad = _round_up(B, tb)

    # Zero-pad batch rows and feature lanes (padding contributes nothing).
    x_pad = jnp.zeros((b_pad, obs_pad), jnp.float32).at[:B, :obs_size].set(x)

    out_pad = pl.pallas_call(
        partial(_actor_kernel, obs_pad=obs_pad),
        out_shape=jax.ShapeDtypeStruct((b_pad, F_PAD), jnp.float32),
        grid=(b_pad // tb,),
        in_specs=[
            pl.BlockSpec((tb, obs_pad), lambda i: (i, 0)),
            # Constant index_map -> weight slab DMA'd once, resident in VMEM.
            pl.BlockSpec((slab_rows, F_PAD), lambda i: (0, 0)),
        ],
        out_specs=pl.BlockSpec((tb, F_PAD), lambda i: (i, 0)),
        compiler_params=pltpu.CompilerParams(
            dimension_semantics=("parallel",)),
    )(x_pad, slab)

    return out_pad[:B, :act_size]


def init_params(key, obs_size, act_size):
    """Deterministic synthetic init (shapes match the nn.Linear layers)."""
    ks = jax.random.split(key, 6)

    def uniform_fan_in(k, shape, fan_in):
        bound = 1.0 / jnp.sqrt(jnp.float32(fan_in))
        return jax.random.uniform(k, shape, jnp.float32, -bound, bound)

    return {
        "w1": uniform_fan_in(ks[0], (obs_size, HID_SIZE), obs_size),
        "b1": uniform_fan_in(ks[1], (1, HID_SIZE), obs_size),
        "w2": uniform_fan_in(ks[2], (HID_SIZE, HID_SIZE), HID_SIZE),
        "b2": uniform_fan_in(ks[3], (1, HID_SIZE), HID_SIZE),
        "w3": uniform_fan_in(ks[4], (HID_SIZE, act_size), HID_SIZE),
        "b3": uniform_fan_in(ks[5], (1, act_size), HID_SIZE),
        # logstd exists in the module but is not used by forward().
        "logstd": jnp.zeros((act_size,), jnp.float32),
    }


def reference_forward(x, params):
    h1 = jnp.tanh(x @ params["w1"] + params["b1"])
    h2 = jnp.tanh(h1 @ params["w2"] + params["b2"])
    return jnp.tanh(h2 @ params["w3"] + params["b3"])


if __name__ == "__main__":
    # HalfCheetah-ish small shapes: obs_size=26, act_size=6, batch=8.
    OBS_SIZE, ACT_SIZE, BATCH = 26, 6, 8

    key = jax.random.PRNGKey(0)
    k_params, k_x = jax.random.split(key)
    params = init_params(k_params, OBS_SIZE, ACT_SIZE)
    slab = pack_params(params)          # packed once, reused for every call

    # Small-batch check (grid = 1 step).
    x_small = jax.random.normal(k_x, (BATCH, OBS_SIZE), jnp.float32)
    out_small = jax.block_until_ready(model_actor_forward(x_small, slab, ACT_SIZE))
    ref_small = reference_forward(x_small, params)
    assert out_small.shape == (BATCH, ACT_SIZE)
    assert jnp.allclose(out_small, ref_small, atol=1e-5, rtol=1e-5)

    # Larger-batch check exercising the tiled parallel grid
    # (TB=1024, batch 1040 padded to 2048 -> 2 grid steps).
    x_big = jax.random.normal(jax.random.PRNGKey(1), (1040, OBS_SIZE), jnp.float32)
    out_big = jax.block_until_ready(model_actor_forward(x_big, slab, ACT_SIZE))
    ref_big = reference_forward(x_big, params)
    assert out_big.shape == (1040, ACT_SIZE)
    assert jnp.allclose(out_big, ref_big, atol=1e-5, rtol=1e-5)

    print("KERNEL_OK")
</pallas_src>

<mosaic_0001>
module attributes {stable_mosaic.version = 11 : i64} {
  func.func @_actor_kernel(%arg0: i32, %arg1: memref<8x128xf32, #tpu.memory_space<vmem>>, %arg2: memref<392x128xf32, #tpu.memory_space<vmem>>, %arg3: memref<8x128xf32, #tpu.memory_space<vmem>>) attributes {dimension_semantics = [#tpu.dimension_semantics<parallel>], iteration_bounds = array<i64: 1>, scalar_prefetch = 0 : i64, scratch_operands = 0 : i64, tpu.core_type = #tpu.core_type<tc>, window_params = [{transform_indices = @transform_0, window_bounds = array<i64: 8, 128>}, {pipeline_mode = #tpu.pipeline_mode<synchronous>, transform_indices = @transform_1, window_bounds = array<i64: 392, 128>}, {transform_indices = @transform_2, window_bounds = array<i64: 8, 128>}]} {
    %c0 = arith.constant 0 : index
    %c0_0 = arith.constant 0 : index
    %0 = vector.load %arg1[%c0, %c0_0] : memref<8x128xf32, #tpu.memory_space<vmem>>, vector<8x128xf32>
    %c0_1 = arith.constant 0 : index
    %c0_2 = arith.constant 0 : index
    %1 = vector.load %arg2[%c0_1, %c0_2] : memref<392x128xf32, #tpu.memory_space<vmem>>, vector<128x128xf32>
    %c128 = arith.constant 128 : index
    %c0_3 = arith.constant 0 : index
    %2 = vector.load %arg2[%c128, %c0_3] : memref<392x128xf32, #tpu.memory_space<vmem>>, vector<128x128xf32>
    %c256 = arith.constant 256 : index
    %c0_4 = arith.constant 0 : index
    %3 = vector.load %arg2[%c256, %c0_4] : memref<392x128xf32, #tpu.memory_space<vmem>>, vector<128x128xf32>
    %c384 = arith.constant 384 : index
    %c0_5 = arith.constant 0 : index
    %4 = vector.load %arg2[%c384, %c0_5] : memref<392x128xf32, #tpu.memory_space<vmem>>, vector<8x128xf32>
    %5 = vector.extract_strided_slice %4 {offsets = [0, 0], sizes = [1, 128], strides = [1, 1]} : vector<8x128xf32> to vector<1x128xf32>
    %6 = vector.extract_strided_slice %4 {offsets = [1, 0], sizes = [1, 128], strides = [1, 1]} : vector<8x128xf32> to vector<1x128xf32>
    %7 = vector.extract_strided_slice %4 {offsets = [2, 0], sizes = [1, 128], strides = [1, 1]} : vector<8x128xf32> to vector<1x128xf32>
    %cst = arith.constant dense<0.000000e+00> : vector<8x128xf32>
    %8 = tpu.matmul %0, %1, %cst {dimension_numbers = #tpu.dot_dimension_numbers<[1], [0], [0], [1], [0, 0, 1, 1], [], []>} : vector<8x128xf32>, vector<128x128xf32>, vector<8x128xf32> -> vector<8x128xf32>
    %9 = vector.broadcast %5 : vector<1x128xf32> to vector<8x128xf32>
    %10 = arith.addf %8, %9 : vector<8x128xf32>
    %11 = math.tanh %10 : vector<8x128xf32>
    %cst_6 = arith.constant dense<0.000000e+00> : vector<8x128xf32>
    %12 = tpu.matmul %11, %2, %cst_6 {dimension_numbers = #tpu.dot_dimension_numbers<[1], [0], [0], [1], [0, 0, 1, 1], [], []>} : vector<8x128xf32>, vector<128x128xf32>, vector<8x128xf32> -> vector<8x128xf32>
    %13 = vector.broadcast %6 : vector<1x128xf32> to vector<8x128xf32>
    %14 = arith.addf %12, %13 : vector<8x128xf32>
    %15 = math.tanh %14 : vector<8x128xf32>
    %cst_7 = arith.constant dense<0.000000e+00> : vector<8x128xf32>
    %16 = tpu.matmul %15, %3, %cst_7 {dimension_numbers = #tpu.dot_dimension_numbers<[1], [0], [0], [1], [0, 0, 1, 1], [], []>} : vector<8x128xf32>, vector<128x128xf32>, vector<8x128xf32> -> vector<8x128xf32>
    %17 = vector.broadcast %7 : vector<1x128xf32> to vector<8x128xf32>
    %18 = arith.addf %16, %17 : vector<8x128xf32>
    %19 = math.tanh %18 : vector<8x128xf32>
    %c0_8 = arith.constant 0 : index
    %c0_9 = arith.constant 0 : index
    %20 = vector.load %arg3[%c0_8, %c0_9] : memref<8x128xf32, #tpu.memory_space<vmem>>, vector<8x128xf32>
    tpu.vector_store %arg3[%c0_8, %c0_9], %19 {strides = array<i32>} : memref<8x128xf32, #tpu.memory_space<vmem>>, vector<8x128xf32>,
    return
  }
  func.func @transform_0(%arg0: i32) -> (i32, i32) {
    %c0_i32 = arith.constant 0 : i32
    %c0_i32_0 = arith.constant 0 : i32
    return %arg0, %c0_i32 : i32, i32
  }
  func.func @transform_1(%arg0: i32) -> (i32, i32) {
    %c0_i32 = arith.constant 0 : i32
    %c0_i32_0 = arith.constant 0 : i32
    %c0_i32_1 = arith.constant 0 : i32
    return %c0_i32, %c0_i32_0 : i32, i32
  }
  func.func @transform_2(%arg0: i32) -> (i32, i32) {
    %c0_i32 = arith.constant 0 : i32
    %c0_i32_0 = arith.constant 0 : i32
    return %arg0, %c0_i32 : i32, i32
  }
}

</mosaic_0001>

<bundles_post_ra>
// kernel: model_actor_forward.1
= control target key start
LH: loop header
LB: loop body
LE: loop exit
PB: predicated region body
PF: predicated region fallthrough
CT: control target
= control target key end

     0   :  { %7 = vsyncpa [#allocation3], 0  ;;  %s613_s0 = inlined_call_operand.vmem [shape: f32[8,128], index: 0, kind: input, shape index: {}]   ;;  %s614_s1 = inlined_call_operand.hbm [shape: f32[392,128], index: 1, kind: input, shape index: {}]   ;;  %s615_s2 = inlined_call_operand.hbm [shape: f32[8,128], index: 2, kind: output, shape index: {}]  }
   0x1   :  { %8 = vsyncpa [#allocation4], 0  ;;  %s529_s9 = smov [#allocation2]  }
   0x2   :  { %s16_s10 = sshll.u32 %s529_s9, 4  ;;  %s17_s10 = int_to_ptr.vmem [resolvable:$true] %s16_s10 }
   0x3   :  { %s493_s11 = scalar_lea.vmem %s17_s10, 6272  ;;  %p498_p1 = scmp.lt.s32.totalorder %s17_s10, %s17_s10 }
   0x4   :  { %p494_p0 = scmp.ne.s32.totalorder %s17_s10, %s493_s11  ;;  %p499_p2 = scmp.lt.s32.totalorder %s493_s11, %s493_s11 }
   0x6   :  { %p500_p3 = por %p499_p2, %p498_p1 }
   0x8   :  { %p501_p4 = pnand %p500_p3, %p494_p0 }
   0xa   :  { %504 = shalt.err (!%p501_p4)
}
   0xb   :  { %s530_s12 = smov 128   ;;  %s531_s13 = smov 8  }
   0xc   :  { %22 = dma.hbm_to_vmem [thread:$0]  %s614_s1, 6272, %s17_s10, [#allocation3], %s530_s12, %s530_s12, %s531_s13  }
   0xd   :  { %525 = dma.done.wait [#allocation3], 6272  }
   0xe   :  { %526 = vsyncadd [#allocation3], 4294961024  ;;  %v532_v0 = vmov 0.0   ;;  %vm533_vm0 = vmmov 0   ;;  %v42_v1 = vld [vmem:[#allocation2 + $0x78] sm:$0xff]  ;;  %v41_v2 = vld [vmem:[#allocation2 + $0x70] sm:$0xff]  ;;  %v76_v41 = vlaneseq }
   0xf   :  { %368 = vmatprep.subr.mxu0 %v532_v0  ;;  %400 = vmatprep.mubr.msk.f32.mxu0 %vm533_vm0, %v532_v0  ;;  %v40_v3 = vld [vmem:[#allocation2 + $0x68] sm:$0xff]  ;;  %v39_v4 = vld [vmem:[#allocation2 + $0x60] sm:$0xff]  ;;  %v58_v5 = vld [vmem:[#allocation2 + $0xf8] sm:$0xff] }
  0x10   :  { %403 = vmatprep.subr.mxu1 %v532_v0  ;;  %435 = vmatprep.mubr.msk.f32.mxu1 %vm533_vm0, %v532_v0  ;;  %v38_v6 = vld [vmem:[#allocation2 + $0x58] sm:$0xff]  ;;  %v57_v7 = vld [vmem:[#allocation2 + $0xf0] sm:$0xff]  ;;  %v56_v8 = vld [vmem:[#allocation2 + $0xe8] sm:$0xff]  ;;  %v77_v42 = vshrl.u32 %v76_v41, 7 }
  0x11   :  { %369 = vmatpush3.msra.mxu0 %v42_v1  ;;  %404 = vmatpush3.msra.mxu1 %v58_v5  ;;  %v37_v9 = vld [vmem:[#allocation2 + $0x50] sm:$0xff]  ;;  %v55_v10 = vld [vmem:[#allocation2 + $0xe0] sm:$0xff]  ;;  %v36_v11 = vld [vmem:[#allocation2 + $0x48] sm:$0xff] }
  0x12   :  { %370 = vmatprep.subr.mxu0 %v532_v0  ;;  %405 = vmatprep.subr.mxu1 %v532_v0  ;;  %v54_v12 = vld [vmem:[#allocation2 + $0xd8] sm:$0xff]  ;;  %v35_v13 = vld [vmem:[#allocation2 + $0x40] sm:$0xff]  ;;  %v53_v14 = vld [vmem:[#allocation2 + $0xd0] sm:$0xff]  ;;  %v78_v43 = vsub.s32 0, %v77_v42  ;;  %v153_v59 = vsub.s32 1, %v77_v42 }
  0x13   :  { %371 = vmatpush3.msra.mxu0 %v41_v2  ;;  %406 = vmatpush3.msra.mxu1 %v57_v7  ;;  %v34_v15 = vld [vmem:[#allocation2 + $0x38] sm:$0xff]  ;;  %v52_v16 = vld [vmem:[#allocation2 + $0xc8] sm:$0xff]  ;;  %v33_v17 = vld [vmem:[#allocation2 + $0x30] sm:$0xff]  ;;  %v228_v2 = vsub.s32 2, %v77_v42 }
  0x14   :  { %372 = vmatprep.subr.mxu0 %v532_v0  ;;  %407 = vmatprep.subr.mxu1 %v532_v0  ;;  %v32_v18 = vld [vmem:[#allocation2 + $0x28] sm:$0xff]  ;;  %v31_v19 = vld [vmem:[#allocation2 + $0x20] sm:$0xff]  ;;  %v30_v20 = vld [vmem:[#allocation2 + $0x18] sm:$0xff] }
  0x15   :  { %373 = vmatpush3.msra.mxu0 %v40_v3  ;;  %408 = vmatpush3.msra.mxu1 %v56_v8  ;;  %v29_v21 = vld [vmem:[#allocation2 + $0x10] sm:$0xff]  ;;  %v28_v22 = vld [vmem:[#allocation2 + $0x8] sm:$0xff]  ;;  %v27_v23 = vld [vmem:[#allocation2] sm:$0xff] }
  0x16   :  { %374 = vmatprep.subr.mxu0 %v532_v0  ;;  %409 = vmatprep.subr.mxu1 %v532_v0  ;;  %v26_v24 = vld [vmem:[%s613_s0] sm:$0xff]  ;;  %v50_v26 = vld [vmem:[#allocation2 + $0xb8] sm:$0xff]  ;;  %v49_v27 = vld [vmem:[#allocation2 + $0xb0] sm:$0xff]  ;;  %s534_s0 = smov [#allocation5]  }
  0x17   :  { %375 = vmatpush3.msra.mxu0 %v39_v4  ;;  %410 = vmatpush3.msra.mxu1 %v55_v10  ;;  %v51_v25 = vld [vmem:[#allocation2 + $0xc0] sm:$0xff]  ;;  %v48_v28 = vld [vmem:[#allocation2 + $0xa8] sm:$0xff]  ;;  %v46_v30 = vld [vmem:[#allocation2 + $0x98] sm:$0xff]  ;;  %s308_s17 = sshll.u32 %s534_s0, 4  ;;  %s309_s17 = int_to_ptr.vmem [resolvable:$true] %s308_s17 }
  0x18   :  { %376 = vmatprep.subr.mxu0 %v532_v0  ;;  %411 = vmatprep.subr.mxu1 %v532_v0  ;;  %v47_v29 = vld [vmem:[#allocation2 + $0xa0] sm:$0xff]  ;;  %v45_v31 = vld [vmem:[#allocation2 + $0x90] sm:$0xff]  ;;  %v44_v32 = vld [vmem:[#allocation2 + $0x88] sm:$0xff]  ;;  %s505_s18 = scalar_lea.vmem %s309_s17, 128  ;;  %p510_p6 = scmp.lt.s32.totalorder %s309_s17, %s309_s17 }
  0x19   :  { %377 = vmatpush3.msra.mxu0 %v38_v6  ;;  %412 = vmatpush3.msra.mxu1 %v54_v12  ;;  %v43_v33 = vld [vmem:[#allocation2 + $0x80] sm:$0xff]  ;;  %v74_v34 = vld [vmem:[#allocation2 + $0x178] sm:$0xff]  ;;  %v73_v35 = vld [vmem:[#allocation2 + $0x170] sm:$0xff]  ;;  %p506_p5 = scmp.ne.s32.totalorder %s309_s17, %s505_s18  ;;  %p511_p7 = scmp.lt.s32.totalorder %s505_s18, %s505_s18 }
  0x1a   :  { %378 = vmatprep.subr.mxu0 %v532_v0  ;;  %413 = vmatprep.subr.mxu1 %v532_v0  ;;  %v72_v36 = vld [vmem:[#allocation2 + $0x168] sm:$0xff]  ;;  %v71_v37 = vld [vmem:[#allocation2 + $0x160] sm:$0xff]  ;;  %v70_v38 = vld [vmem:[#allocation2 + $0x158] sm:$0xff] }
  0x1b   :  { %379 = vmatpush3.msra.mxu0 %v37_v9  ;;  %414 = vmatpush3.msra.mxu1 %v53_v14  ;;  %v69_v39 = vld [vmem:[#allocation2 + $0x150] sm:$0xff]  ;;  %v68_v40 = vld [vmem:[#allocation2 + $0x148] sm:$0xff]  ;;  %v75_v44 = vld [vmem:[#allocation2 + $0x180] sm:$0xff]  ;;  %p512_p8 = por %p511_p7, %p510_p6 }
  0x1c   :  { %380 = vmatprep.subr.mxu0 %v532_v0  ;;  %415 = vmatprep.subr.mxu1 %v532_v0  ;;  %v79_v45 = vrot.slane %v75_v44, %v78_v43  ;;  %v67_v50 = vld [vmem:[#allocation2 + $0x140] sm:$0xff]  ;;  %v66_v51 = vld [vmem:[#allocation2 + $0x138] sm:$0xff]  ;;  %v65_v52 = vld [vmem:[#allocation2 + $0x130] sm:$0xff]  ;;  %v154_v60 = vrot.slane %v75_v44, %v153_v59  ;;  %v229_v3 = vrot.slane %v75_v44, %v228_v2 }
  0x1d   :  { %381 = vmatpush3.msra.mxu0 %v36_v11  ;;  %416 = vmatpush3.msra.mxu1 %v52_v16  ;;  %v64_v53 = vld [vmem:[#allocation2 + $0x128] sm:$0xff]  ;;  %v63_v54 = vld [vmem:[#allocation2 + $0x120] sm:$0xff]  ;;  %v62_v55 = vld [vmem:[#allocation2 + $0x118] sm:$0xff]  ;;  %p513_p9 = pnand %p512_p8, %p506_p5 }
  0x1e   :  { %382 = vmatprep.subr.mxu0 %v532_v0  ;;  %417 = vmatprep.subr.mxu1 %v532_v0  ;;  %v61_v56 = vld [vmem:[#allocation2 + $0x110] sm:$0xff]  ;;  %v60_v57 = vld [vmem:[#allocation2 + $0x108] sm:$0xff]  ;;  %v59_v58 = vld [vmem:[#allocation2 + $0x100] sm:$0xff] }
  0x1f   :  { %383 = vmatpush3.msra.mxu0 %v35_v13  ;;  %418 = vmatpush3.msra.mxu1 %v51_v25 }
  0x20   :  { %384 = vmatprep.subr.mxu0 %v532_v0  ;;  %419 = vmatprep.subr.mxu1 %v532_v0 }
  0x21   :  { %385 = vmatpush3.msra.mxu0 %v34_v15  ;;  %420 = vmatpush3.msra.mxu1 %v50_v26 }
  0x22   :  { %386 = vmatprep.subr.mxu0 %v532_v0  ;;  %421 = vmatprep.subr.mxu1 %v532_v0 }
  0x23   :  { %387 = vmatpush3.msra.mxu0 %v33_v17  ;;  %422 = vmatpush3.msra.mxu1 %v49_v27 }
  0x24   :  { %388 = vmatprep.subr.mxu0 %v532_v0  ;;  %423 = vmatprep.subr.mxu1 %v532_v0 }
  0x25   :  { %389 = vmatpush3.msra.mxu0 %v32_v18  ;;  %424 = vmatpush3.msra.mxu1 %v48_v28 }
  0x26   :  { %390 = vmatprep.subr.mxu0 %v532_v0  ;;  %425 = vmatprep.subr.mxu1 %v532_v0 }
  0x27   :  { %391 = vmatpush3.msra.mxu0 %v31_v19  ;;  %426 = vmatpush3.msra.mxu1 %v47_v29 }
  0x28   :  { %392 = vmatprep.subr.mxu0 %v532_v0  ;;  %427 = vmatprep.subr.mxu1 %v532_v0 }
  0x29   :  { %393 = vmatpush3.msra.mxu0 %v30_v20  ;;  %428 = vmatpush3.msra.mxu1 %v46_v30 }
  0x2a   :  { %394 = vmatprep.subr.mxu0 %v532_v0  ;;  %429 = vmatprep.subr.mxu1 %v532_v0 }
  0x2b   :  { %395 = vmatpush3.msra.mxu0 %v29_v21  ;;  %430 = vmatpush3.msra.mxu1 %v45_v31 }
  0x2c   :  { %396 = vmatprep.subr.mxu0 %v532_v0  ;;  %431 = vmatprep.subr.mxu1 %v532_v0 }
  0x2d   :  { %397 = vmatpush3.msra.mxu0 %v28_v22  ;;  %432 = vmatpush3.msra.mxu1 %v44_v32 }
  0x2e   :  { %398 = vmatprep.subr.mxu0 %v532_v0  ;;  %433 = vmatprep.subr.mxu1 %v532_v0 }
  0x2f   :  { %399 = vmatpush3.msra.mxu0 %v27_v23  ;;  %434 = vmatpush3.msra.mxu1 %v43_v33 }
  0x30   :  { %401 = vmatmul.mubr.f32.vlgmr.msra.gmra.mxu0 %v26_v24  ;;  %438 = vmatprep.subr.mxu0 %v532_v0 }
  0x31   :  { %470 = vmatprep.mubr.msk.f32.mxu0 %vm533_vm0, %v532_v0  ;;  %439 = vmatpush3.msra.mxu0 %v74_v34 }
  0x32   :  { %440 = vmatprep.subr.mxu0 %v532_v0 }
  0x33   :  { %441 = vmatpush3.msra.mxu0 %v73_v35 }
  0x34   :  { %442 = vmatprep.subr.mxu0 %v532_v0 }
  0x35   :  { %443 = vmatpush3.msra.mxu0 %v72_v36 }
  0x36   :  { %444 = vmatprep.subr.mxu0 %v532_v0 }
  0x37   :  { %445 = vmatpush3.msra.mxu0 %v71_v37 }
  0x38   :  { %446 = vmatprep.subr.mxu0 %v532_v0 }
  0x39   :  { %447 = vmatpush3.msra.mxu0 %v70_v38 }
  0x3a   :  { %448 = vmatprep.subr.mxu0 %v532_v0 }
  0x3b   :  { %449 = vmatpush3.msra.mxu0 %v69_v39 }
  0x3c   :  { %450 = vmatprep.subr.mxu0 %v532_v0 }
  0x3d   :  { %451 = vmatpush3.msra.mxu0 %v68_v40 }
  0x3e   :  { %452 = vmatprep.subr.mxu0 %v532_v0 }
  0x3f   :  { %453 = vmatpush3.msra.mxu0 %v67_v50 }
  0x40   :  { %454 = vmatprep.subr.mxu0 %v532_v0 }
  0x41   :  { %455 = vmatpush3.msra.mxu0 %v66_v51 }
  0x42   :  { %456 = vmatprep.subr.mxu0 %v532_v0 }
  0x43   :  { %457 = vmatpush3.msra.mxu0 %v65_v52 }
  0x44   :  { %458 = vmatprep.subr.mxu0 %v532_v0 }
  0x45   :  { %459 = vmatpush3.msra.mxu0 %v64_v53 }
  0x46   :  { %460 = vmatprep.subr.mxu0 %v532_v0 }
  0x47   :  { %461 = vmatpush3.msra.mxu0 %v63_v54 }
  0x48   :  { %462 = vmatprep.subr.mxu0 %v532_v0 }
  0x49   :  { %463 = vmatpush3.msra.mxu0 %v62_v55 }
  0x4a   :  { %464 = vmatprep.subr.mxu0 %v532_v0 }
  0x4b   :  { %465 = vmatpush3.msra.mxu0 %v61_v56 }
  0x4c   :  { %466 = vmatprep.subr.mxu0 %v532_v0 }
  0x4d   :  { %467 = vmatpush3.msra.mxu0 %v60_v57 }
  0x4e   :  { %468 = vmatprep.subr.mxu0 %v532_v0 }
  0x4f   :  { %469 = vmatpush3.msra.mxu0 %v59_v58 }
  0xf0   :  { %v146_v46 = vpop.f32.mrf.mxu0 }
  0xf1   :  { %v147_v47 = vadd.f32 %v146_v46, %v79_v45 }
  0xf2   :  { %v402_v48 = vpop.f32.mrf.mxu0 }
  0xf3   :  { %479 = vtanh.f32 %v147_v47 }
 0x100   :  { %v480_v49 = vpop.eup %479 }
 0x101   :  { %436 = vmatmul.mubr.f32.vlgmr.msra.gmra.mxu1 %v480_v49 }
 0x1c1   :  { %v221_v61 = vpop.f32.mrf.mxu1 }
 0x1c2   :  { %v222_v62 = vadd.f32 %v221_v61, %v154_v60 }
 0x1c3   :  { %v437_v63 = vpop.f32.mrf.mxu1 }
 0x1c4   :  { %481 = vtanh.f32 %v222_v62 }
 0x1d1   :  { %v482_v1 = vpop.eup %481 }
 0x1d2   :  { %471 = vmatmul.mubr.f32.vlgmr.msra.gmra.mxu0 %v482_v1 }
 0x292   :  { %v296_v4 = vpop.f32.mrf.mxu0 }
 0x293   :  { %v297_v5 = vadd.f32 %v296_v4, %v229_v3 }
 0x294   :  { %v472_v6 = vpop.f32.mrf.mxu0 }
 0x295   :  { %483 = vtanh.f32 %v297_v5 }
 0x2a2   :  { %v484_v7 = vpop.eup %483 }
 0x2a3   :  { %301 = vst [vmem:[#allocation5] sm:$0xff] %v484_v7 }
 0x2a4   :  { %516 = shalt.err (!%p513_p9)
}
 0x2a5   :  { %311 = dma.vmem_to_hbm [thread:$0]  %s309_s17, 128, %s615_s2, [#allocation4]  }
 0x2a6   :  { %527 = dma.done.wait [#allocation4], 128  }
 0x2a7   :  { %528 = vsyncadd [#allocation4], 4294967168 }
 0x2a8   :  { %315 = vsyncpa [#allocation3], 1 }
 0x2a9   :  { %316 = vsyncpa [#allocation4], 1 }

</bundles_post_ra>
